<compile_context>
chip_gen: v5e
topology: v5e:2x2
jax: 0.10.0
libtpu: 0.0.40
codegen_flags: <defaults>
</compile_context>

<pallas_src>
import math

import jax
import jax.numpy as jnp
from jax.experimental import pallas as pl
from jax.experimental.pallas import tpu as pltpu


_LANES = 128
# Block sublane granularity that is layout-legal for f32 (8), bf16 (16), int8/fp8 (32).
_ROW_ALIGN = 32
# Working-set budget for double-buffered input/output tiles.  Fits inside every
# generation's default scoped VMEM (v5e 16 MiB, v6e/v7x 32 MiB) and well below
# v7x's 64 MiB physical VMEM.
_VMEM_BUDGET_BYTES = 12 * 1024 * 1024
_VMEM_LIMIT_BYTES = 32 * 1024 * 1024


def _plan_rows(num_rows, block_rows, n_in_planes, in_bytes):
    """Rows-per-grid-step (tr) for a (num_rows, 128) lane-dense layout.

    Sized so double-buffered inputs (n_in_planes planes, in_bytes/elem) plus the
    double-buffered f32 output stay inside _VMEM_BUDGET_BYTES while keeping
    per-step DMA >= ~1 MiB (85%+ of HBM roofline regime).
    """
    per_row_bytes = (2 * n_in_planes * in_bytes + 2 * 4) * _LANES
    cap = _VMEM_BUDGET_BYTES // per_row_bytes
    cap = max(_ROW_ALIGN, (cap // _ROW_ALIGN) * _ROW_ALIGN)
    tr = max(_ROW_ALIGN, min(int(block_rows), cap))
    tr = (tr // _ROW_ALIGN) * _ROW_ALIGN
    if num_rows <= tr:
        tr = num_rows  # single block == full array extent (always layout-legal)
    return tr


def _as_lane_planes(flat, num_rows, fill):
    """(..., M) -> (..., num_rows, 128); pads only the <=127-element tail.

    The pad is skipped entirely (zero-copy reshape) when M % 128 == 0.
    """
    m = flat.shape[-1]
    m_pad = num_rows * _LANES
    if m_pad != m:
        pad = [(0, 0)] * (flat.ndim - 1) + [(0, m_pad - m)]
        flat = jnp.pad(flat, pad, constant_values=fill)
    return flat.reshape(flat.shape[:-1] + (num_rows, _LANES))


def _keep_float(x):
    x = jnp.asarray(x)
    if x.dtype not in (jnp.float32, jnp.bfloat16):
        x = x.astype(jnp.float32)
    return x


# ---------------------------------------------------------------------------
# Generic module forward: out = vX @ W.T + b   (Linear(dim_input, 1))
# ---------------------------------------------------------------------------
def _linear_vpu_kernel(w_ref, b_ref, x_ref, o_ref):
    # w_ref: (F,) f32 SMEM, b_ref: (1,) f32 SMEM,
    # x_ref: (F, tr, 128) VMEM (per-feature lane-dense planes, f32 or bf16),
    # o_ref: (tr, 128) f32 VMEM.
    n_feat = x_ref.shape[0]
    acc = x_ref[0].astype(jnp.float32) * w_ref[0]
    for f in range(1, n_feat):            # static unroll over dim_input (small)
        acc = acc + x_ref[f].astype(jnp.float32) * w_ref[f]
    o_ref[...] = acc + b_ref[0]


def _linear_planes(x_fm, weight, bias, *, block_rows):
    """x_fm: (F, M) feature-major (f32 or bf16).  Returns flat (rows*128,) f32."""
    F, M = x_fm.shape
    w = jnp.asarray(weight, jnp.float32).reshape(-1)
    assert w.shape == (F,), "out_features must be 1 and weight must match dim_input"
    b = jnp.asarray(bias, jnp.float32).reshape(1)

    x_fm = _keep_float(x_fm)
    in_bytes = jnp.dtype(x_fm.dtype).itemsize

    rows = pl.cdiv(M, _LANES)
    tr = _plan_rows(rows, block_rows, F, in_bytes)
    x_planes = _as_lane_planes(x_fm, rows, 0.0)          # (F, rows, 128)

    out2d = pl.pallas_call(
        _linear_vpu_kernel,
        out_shape=jax.ShapeDtypeStruct((rows, _LANES), jnp.float32),
        grid_spec=pltpu.PrefetchScalarGridSpec(
            num_scalar_prefetch=0,
            grid=(pl.cdiv(rows, tr),),                   # ragged last block OK
            in_specs=[
                pl.BlockSpec(memory_space=pltpu.MemorySpace.SMEM),   # weight (F,)
                pl.BlockSpec(memory_space=pltpu.MemorySpace.SMEM),   # bias (1,)
                pl.BlockSpec((F, tr, _LANES), lambda i: (0, i, 0)),  # feature planes
            ],
            out_specs=pl.BlockSpec((tr, _LANES), lambda i: (i, 0)),
        ),
        compiler_params=pltpu.CompilerParams(
            dimension_semantics=("parallel",),
            vmem_limit_bytes=_VMEM_LIMIT_BYTES,
        ),
    )(w, b, x_planes)

    return out2d.reshape(rows * _LANES)


def nn_original_gravity_forward(vX, weight, bias, *, block_rows=4096):
    """Pallas implementation of NN_OriginalGravity.forward.

    vX:     (B, N, F) float32/bfloat16
    weight: (1, F) float32 (torch.nn.Linear layout) or (F,)
    bias:   (1,) float32
    returns (B, N, 1) float32
    """
    B, N, F = vX.shape
    M = B * N
    # (B, N, F) -> (F, M).  This transpose is the one unavoidable HBM copy for
    # feature-last input; callers able to provide feature-major data should use
    # nn_original_gravity_forward_feature_major (zero extra copies when M%128==0).
    x_fm = jnp.transpose(_keep_float(vX).reshape(M, F), (1, 0))
    out_flat = _linear_planes(x_fm, weight, bias, block_rows=block_rows)
    return out_flat[:M].reshape(B, N, 1)


def nn_original_gravity_forward_feature_major(x_fm, weight, bias, *, block_rows=4096):
    """Same forward, but input is feature-major (F, M); returns (M, 1) float32."""
    F, M = x_fm.shape
    out_flat = _linear_planes(x_fm, weight, bias, block_rows=block_rows)
    return out_flat[:M].reshape(M, 1)


# ---------------------------------------------------------------------------
# Fused variant (df='exponential'): builds [log(dest_feature), distance] inside
# the kernel, so vX never hits HBM.  out == forward(stack([log(f), d], -1)).
# ---------------------------------------------------------------------------
def _gravity_fused_kernel(w_ref, b_ref, feat_ref, dist_ref, o_ref):
    # Feature order matches get_X_T for df='exponential':
    #   out = w[0]*log(dest_feature) + w[1]*distance + b
    # EUP log + VPU mul/add; weights/bias are SMEM scalars.
    feat = feat_ref[...].astype(jnp.float32)
    dist = dist_ref[...].astype(jnp.float32)
    o_ref[...] = jnp.log(feat) * w_ref[0] + dist * w_ref[1] + b_ref[0]


def nn_original_gravity_forward_fused(dest_features, distances, weight, bias,
                                      *, block_rows=4096):
    """Fused get_X_T feature build + forward for df='exponential'.

    dest_features, distances: (B, N) float32/bfloat16 -> (B, N, 1) float32
    """
    B, N = dest_features.shape
    M = B * N

    w = jnp.asarray(weight, jnp.float32).reshape(-1)
    assert w.shape == (2,), "df='exponential' implies dim_input == 2"
    b = jnp.asarray(bias, jnp.float32).reshape(1)

    feat = _keep_float(dest_features).reshape(M)
    dist = _keep_float(distances).reshape(M)
    in_bytes = max(jnp.dtype(feat.dtype).itemsize, jnp.dtype(dist.dtype).itemsize)

    rows = pl.cdiv(M, _LANES)
    tr = _plan_rows(rows, block_rows, 2, in_bytes)

    # Padded-tail fill of 1.0 keeps log() finite in the (discarded) dead lanes;
    # distances pad with 0.0.  Pad is <=127 elements and skipped when aligned.
    feat2d = _as_lane_planes(feat, rows, 1.0)
    dist2d = _as_lane_planes(dist, rows, 0.0)

    out2d = pl.pallas_call(
        _gravity_fused_kernel,
        out_shape=jax.ShapeDtypeStruct((rows, _LANES), jnp.float32),
        grid_spec=pltpu.PrefetchScalarGridSpec(
            num_scalar_prefetch=0,
            grid=(pl.cdiv(rows, tr),),                   # ragged last block OK
            in_specs=[
                pl.BlockSpec(memory_space=pltpu.MemorySpace.SMEM),   # weight (2,)
                pl.BlockSpec(memory_space=pltpu.MemorySpace.SMEM),   # bias (1,)
                pl.BlockSpec((tr, _LANES), lambda i: (i, 0)),        # dest features
                pl.BlockSpec((tr, _LANES), lambda i: (i, 0)),        # distances
            ],
            out_specs=pl.BlockSpec((tr, _LANES), lambda i: (i, 0)),
        ),
        compiler_params=pltpu.CompilerParams(
            dimension_semantics=("parallel",),
            vmem_limit_bytes=_VMEM_LIMIT_BYTES,
        ),
    )(w, b, feat2d, dist2d)

    return out2d.reshape(rows * _LANES)[:M].reshape(B, N, 1)


def _torch_linear_init(key, in_features, out_features):
    """Deterministic init mirroring torch.nn.Linear default (uniform +-1/sqrt(fan_in))."""
    kw, kb = jax.random.split(key)
    bound = 1.0 / math.sqrt(in_features)
    weight = jax.random.uniform(
        kw, (out_features, in_features), jnp.float32, minval=-bound, maxval=bound
    )
    bias = jax.random.uniform(
        kb, (out_features,), jnp.float32, minval=-bound, maxval=bound
    )
    return weight, bias


# TODO(synk): get_X_T / get_features / loss / CPC utilities are host-side Python
# (dict lookups, haversine per pair, softmax losses) and are not part of the
# module's forward; only the Linear forward (and its fused feature build) is
# implemented as a Pallas kernel.

if __name__ == "__main__":
    key = jax.random.PRNGKey(0)
    k_feat, k_dist, k_param = jax.random.split(key, 3)

    # Small shapes consistent with the module's get_X_T:
    #   B origins, N destinations per origin, dim_input=2 features per pair.
    B, N, dim_input = 2, 8, 2

    dest_features = jax.random.uniform(
        k_feat, (B, N), jnp.float32, minval=1.0, maxval=100.0
    )
    distances = jax.random.uniform(
        k_dist, (B, N), jnp.float32, minval=0.5, maxval=50.0
    )
    vX = jnp.stack([jnp.log(dest_features), distances], axis=-1)  # (B, N, 2)

    weight, bias = _torch_linear_init(k_param, dim_input, 1)

    # Reference (torch semantics: vX @ W.T + b).
    ref = vX @ weight.T + bias  # (B, N, 1)

    # 1) Module forward on pre-built features (feature-last input).
    out = jax.block_until_ready(nn_original_gravity_forward(vX, weight, bias))
    assert out.shape == (B, N, 1)
    assert jnp.allclose(out, ref, atol=1e-4, rtol=1e-5), "mismatch vs reference"

    # 2) Feature-major entry point (skips the wrapper transpose).
    x_fm = jnp.transpose(vX.reshape(B * N, dim_input), (1, 0))  # (F, M)
    out_fm = jax.block_until_ready(
        nn_original_gravity_forward_feature_major(x_fm, weight, bias)
    )
    assert out_fm.shape == (B * N, 1)
    assert jnp.allclose(out_fm, ref.reshape(B * N, 1), atol=1e-4, rtol=1e-5)

    # 3) Fused feature-build + forward (recommended path, f32).
    out_fused = jax.block_until_ready(
        nn_original_gravity_forward_fused(dest_features, distances, weight, bias)
    )
    assert out_fused.shape == (B, N, 1)
    assert jnp.allclose(out_fused, ref, atol=1e-4, rtol=1e-5), "fused mismatch"

    # 4) Fused path with bfloat16 inputs (half the HBM traffic), f32 math in-kernel.
    feat_bf = dest_features.astype(jnp.bfloat16)
    dist_bf = distances.astype(jnp.bfloat16)
    ref_bf = (
        jnp.log(feat_bf.astype(jnp.float32)) * weight[0, 0]
        + dist_bf.astype(jnp.float32) * weight[0, 1]
        + bias[0]
    )[..., None]
    out_bf = jax.block_until_ready(
        nn_original_gravity_forward_fused(feat_bf, dist_bf, weight, bias)
    )
    assert jnp.allclose(out_bf, ref_bf, atol=1e-3, rtol=1e-3), "bf16 fused mismatch"

    # 5) Larger, lane-misaligned shape with a small tile to exercise the
    #    ragged-grid / tail-pad path (M = 5000, block_rows=32 -> grid of 2).
    B2, N2 = 2, 2500
    df2 = jax.random.uniform(k_feat, (B2, N2), jnp.float32, minval=1.0, maxval=100.0)
    dd2 = jax.random.uniform(k_dist, (B2, N2), jnp.float32, minval=0.5, maxval=50.0)
    vX2 = jnp.stack([jnp.log(df2), dd2], axis=-1)
    ref2 = vX2 @ weight.T + bias
    out2 = jax.block_until_ready(
        nn_original_gravity_forward_fused(df2, dd2, weight, bias, block_rows=32)
    )
    assert jnp.allclose(out2, ref2, atol=1e-4, rtol=1e-5), "ragged-grid mismatch"
    out2g = jax.block_until_ready(
        nn_original_gravity_forward(vX2, weight, bias, block_rows=32)
    )
    assert jnp.allclose(out2g, ref2, atol=1e-4, rtol=1e-5), "ragged-grid generic mismatch"

    print("KERNEL_OK")
</pallas_src>

<mosaic_0001>
module attributes {stable_mosaic.version = 11 : i64} {
  func.func @_linear_vpu_kernel(%arg0: i32, %arg1: memref<2xf32, #tpu.memory_space<smem>>, %arg2: memref<1xf32, #tpu.memory_space<smem>>, %arg3: memref<2x1x128xf32, #tpu.memory_space<vmem>>, %arg4: memref<1x128xf32, #tpu.memory_space<vmem>>) attributes {dimension_semantics = [#tpu.dimension_semantics<parallel>], iteration_bounds = array<i64: 1>, scalar_prefetch = 0 : i64, scratch_operands = 0 : i64, tpu.core_type = #tpu.core_type<tc>, window_params = [{transform_indices = @transform_0, window_bounds = array<i64: 2>}, {transform_indices = @transform_1, window_bounds = array<i64: 1>}, {transform_indices = @transform_2, window_bounds = array<i64: 2, 1, 128>}, {transform_indices = @transform_3, window_bounds = array<i64: 1, 128>}]} {
    %c0 = arith.constant 0 : index
    %c0_0 = arith.constant 0 : index
    %c0_1 = arith.constant 0 : index
    %0 = vector.load %arg3[%c0, %c0_0, %c0_1] : memref<2x1x128xf32, #tpu.memory_space<vmem>>, vector<1x1x128xf32>
    %1 = vector.shape_cast %0 : vector<1x1x128xf32> to vector<1x128xf32>
    %c0_2 = arith.constant 0 : index
    %2 = memref.load %arg1[%c0_2] : memref<2xf32, #tpu.memory_space<smem>>
    %3 = vector.broadcast %2 : f32 to vector<1x128xf32>
    %4 = arith.mulf %1, %3 : vector<1x128xf32>
    %c1 = arith.constant 1 : index
    %c0_3 = arith.constant 0 : index
    %c0_4 = arith.constant 0 : index
    %5 = vector.load %arg3[%c1, %c0_3, %c0_4] : memref<2x1x128xf32, #tpu.memory_space<vmem>>, vector<1x1x128xf32>
    %6 = vector.shape_cast %5 : vector<1x1x128xf32> to vector<1x128xf32>
    %c1_5 = arith.constant 1 : index
    %7 = memref.load %arg1[%c1_5] : memref<2xf32, #tpu.memory_space<smem>>
    %8 = vector.broadcast %7 : f32 to vector<1x128xf32>
    %9 = arith.mulf %6, %8 : vector<1x128xf32>
    %10 = arith.addf %4, %9 : vector<1x128xf32>
    %c0_6 = arith.constant 0 : index
    %11 = memref.load %arg2[%c0_6] : memref<1xf32, #tpu.memory_space<smem>>
    %12 = vector.broadcast %11 : f32 to vector<1x128xf32>
    %13 = arith.addf %10, %12 : vector<1x128xf32>
    %c0_7 = arith.constant 0 : index
    %c0_8 = arith.constant 0 : index
    %14 = vector.load %arg4[%c0_7, %c0_8] : memref<1x128xf32, #tpu.memory_space<vmem>>, vector<1x128xf32>
    tpu.vector_store %arg4[%c0_7, %c0_8], %13 {strides = array<i32>} : memref<1x128xf32, #tpu.memory_space<vmem>>, vector<1x128xf32>,
    return
  }
  func.func @transform_0(%arg0: i32) -> i32 {
    %c0_i32 = arith.constant 0 : i32
    %c0_i32_0 = arith.constant 0 : i32
    return %c0_i32 : i32
  }
  func.func @transform_1(%arg0: i32) -> i32 {
    %c0_i32 = arith.constant 0 : i32
    %c0_i32_0 = arith.constant 0 : i32
    return %c0_i32 : i32
  }
  func.func @transform_2(%arg0: i32) -> (i32, i32, i32) {
    %c0_i32 = arith.constant 0 : i32
    %c0_i32_0 = arith.constant 0 : i32
    %c0_i32_1 = arith.constant 0 : i32
    return %c0_i32, %arg0, %c0_i32_0 : i32, i32, i32
  }
  func.func @transform_3(%arg0: i32) -> (i32, i32) {
    %c0_i32 = arith.constant 0 : i32
    %c0_i32_0 = arith.constant 0 : i32
    return %arg0, %c0_i32 : i32, i32
  }
}

</mosaic_0001>

<bundles_post_ra>
// kernel: tpu_custom_call.1
= control target key start
LH: loop header
LB: loop body
LE: loop exit
PB: predicated region body
PF: predicated region fallthrough
CT: control target
= control target key end

     0   :  { %9 = vsyncpa [#allocation5], 0  ;;  %s141_s0 = inlined_call_operand.hbm [shape: f32[2], index: 0, kind: input, shape index: {}]   ;;  %s142_s1 = inlined_call_operand.<no memory space> [shape: f32[1], index: 1, kind: input, shape index: {}]   ;;  %s143_s2 = inlined_call_operand.vmem [shape: f32[2,1,128], index: 2, kind: input, shape index: {}]   ;;  %s144_s3 = inlined_call_operand.hbm [shape: f32[1,128], index: 3, kind: output, shape index: {}]  }
   0x1   :  { %10 = vsyncpa [#allocation4], 0  ;;  %s16_s14 = sshll.u32 %s141_s0, 4  ;;  %s104_s15 = smov [#allocation3]   ;;  %s17_s14 = int_to_ptr.hbm [resolvable:$true] %s16_s14 }
   0x2   :  { %19 = dma.hbm_to_smem %s17_s14, 16, %s104_s15, [#allocation5]  }
   0x3   :  { %100 = dma.done.wait [#allocation5], 16  }
   0x4   :  { %101 = vsyncadd [#allocation5], 4294967280 }
   0x5   :  { %28 = sfence }
   0x6   :  { %s30_s16 = sld [smem:[#allocation3]]  ;;  %v29_v0 = vld [vmem:[%s143_s2] sm:$0x1]  ;;  %v60_v1 = vld [vmem:[%s143_s2 + $0x1] sm:$0x1]  ;;  %v40_v6 = vstv %s142_s1  ;;  %s105_s23 = smov [#allocation6]  }
   0x7   :  { %s61_s17 = sld [smem:[#allocation3 + $0x1]]  ;;  %s48_s24 = sshll.u32 %s105_s23, 4  ;;  %s49_s24 = int_to_ptr.vmem [resolvable:$true] %s48_s24 }
   0x8   :  { %s50_s27 = sshll.u32 %s144_s3, 4  ;;  %s51_s27 = int_to_ptr.hbm [resolvable:$true] %s50_s27 }
   0xc   :  { %v31_v2 = vstv %s30_s16 }
   0xd   :  { %v32_v3 = vmul.f32 %v31_v2, %v29_v0  ;;  %v36_v4 = vstv %s61_s17 }
   0xe   :  { %v37_v5 = vmul.f32 %v60_v1, %v36_v4 }
  0x10   :  { %v38_v7 = vadd.f32 %v37_v5, %v32_v3 }
  0x12   :  { %v41_v8 = vadd.f32 %v40_v6, %v38_v7 }
  0x14   :  { %42 = vst [vmem:[#allocation6] sm:$0x1] %v41_v8 }
  0x15   :  { %53 = dma.vmem_to_hbm [thread:$0]  %s49_s24, 16, %s51_s27, [#allocation4]  }
  0x16   :  { %102 = dma.done.wait [#allocation4], 16  }
  0x17   :  { %103 = vsyncadd [#allocation4], 4294967280 }
  0x18   :  { %58 = vsyncpa [#allocation4], 1 }
  0x19   :  { %59 = vsyncpa [#allocation5], 1 }

</bundles_post_ra>
